<compile_context>
chip_gen: v7x
topology: tpu7x:2x2x1
jax: 0.10.0
libtpu: 0.0.40
codegen_flags: <defaults>
</compile_context>

<pallas_src>
import jax
import jax.numpy as jnp
from jax.experimental import pallas as pl
from jax.experimental.pallas import tpu as pltpu


def _mine_kernel(idx_ref, joint_ref, w1_ref, bw_ref, out_ref):
    """One grid step = one random permutation of z2's rows.

    idx_ref   : [B, 1]   int32    permutation indices for this grid step
    joint_ref : [B, 2D]  float32  [z1 | z2] rows (resident across grid steps)
    w1_ref    : [2D, H]  float32  first Linear weight (transposed, resident)
    bw_ref    : [2, H]   float32  row 0 = b1, row 1 = second Linear weight
    out_ref   : [1, 1, 1] float32 mi_lb for this permutation
    """
    B, two_d = joint_ref.shape
    D = two_d // 2

    joint = joint_ref[...]                                         # [B, 2D]
    w1 = w1_ref[...]                                               # [2D, H]
    b1 = bw_ref[0:1, :]                                            # [1, H]
    w2t = bw_ref[1:2, :]                                           # [1, H]
    idx = idx_ref[...]                                             # [B, 1] int32

    # One-hot permutation P[i, j] = (j == idx[i]);  P @ joint == joint[idx].
    cols = jax.lax.broadcasted_iota(jnp.int32, (B, B), 1)
    onehot = (cols == idx).astype(jnp.float32)                     # [B, B]
    joint_perm = jnp.dot(onehot, joint,
                         preferred_element_type=jnp.float32)       # [B, 2D]

    # Marginal rows [z1 | z2[idx]]: keep left (z1) half, take permuted right half.
    lane = jax.lax.broadcasted_iota(jnp.int32, (B, two_d), 1)
    marginal = jnp.where(lane < D, joint, joint_perm)              # [B, 2D]

    # Fused first layer: one [2B,2D]@[2D,H] MXU push serves both branches.
    x = jnp.concatenate([joint, marginal], axis=0)                 # [2B, 2D]
    h = jnp.maximum(
        jnp.dot(x, w1, preferred_element_type=jnp.float32) + b1, 0.0)  # [2B, H]
    h_j = h[:B, :]                                                 # joint hidden
    h_m = h[B:, :]                                                 # marginal hidden

    # Second Linear (H -> 1) on VPU + XLU.  b2 is omitted: it cancels exactly
    # in mean(t_joint) - logmeanexp(t_marginal).
    # mean(T(joint)): reduce over the batch (sublane) axis first -> [1,H] work.
    mean_tj = jnp.sum(jnp.sum(h_j, axis=0, keepdims=True) * w2t) * (1.0 / B)

    t_m = jnp.sum(h_m * w2t, axis=-1, keepdims=True)               # [B, 1]
    max_val = jnp.max(t_m)                       # detach() is a no-op in fwd
    log_mean_exp = jnp.log(jnp.mean(jnp.exp(t_m - max_val))) + max_val

    out_ref[...] = jnp.broadcast_to(mean_tj - log_mean_exp, (1, 1, 1))


def mine_strict_forward_batched(z1, z2, params, perm_key, num_permutations):
    """Returns [S] mi_lb estimates, one per random permutation of z2's rows.

    Weights / joint / bias are DMA'd into VMEM once and stay resident across
    the grid=(S,) steps; only the per-step idx and scalar output move.
    """
    S = int(num_permutations)
    B, D = z1.shape
    H = params["w1"].shape[1]

    keys = jax.random.split(perm_key, S)
    idx = jax.vmap(lambda k: jax.random.permutation(k, B))(keys)
    idx = idx.astype(jnp.int32).reshape(S, B, 1)

    # Permutation-independent prep (done once per call, shared by all S steps).
    joint = jnp.concatenate([z1, z2], axis=1).astype(jnp.float32)   # [B, 2D]
    bw = jnp.concatenate([params["b1"], params["w2t"]], axis=0)     # [2, H]

    out = pl.pallas_call(
        _mine_kernel,
        out_shape=jax.ShapeDtypeStruct((S, 1, 1), jnp.float32),
        grid=(S,),
        in_specs=[
            pl.BlockSpec((None, B, 1), lambda s: (s, 0, 0)),   # per-step idx
            pl.BlockSpec((B, 2 * D), lambda s: (0, 0)),        # joint (resident)
            pl.BlockSpec((2 * D, H), lambda s: (0, 0)),        # w1 (resident)
            pl.BlockSpec((2, H), lambda s: (0, 0)),            # b1+w2 (resident)
        ],
        out_specs=pl.BlockSpec((1, 1, 1), lambda s: (s, 0, 0)),
        compiler_params=pltpu.CompilerParams(
            dimension_semantics=("parallel",)),                # v7x: both TCs
    )(idx, joint, params["w1"], bw)
    return out[:, 0, 0]


def mine_strict_forward(z1, z2, params, perm_key):
    """Single-permutation forward, matching MINEStrict.forward semantics."""
    return mine_strict_forward_batched(z1, z2, params, perm_key, 1)[0]


def init_mine_params(key, latent_dim=16, hidden=256):
    """Matches torch init: normal(0, 0.02) weights, zero biases."""
    k1, k2 = jax.random.split(key)
    # nn.Linear(2D, H).weight is [H, 2D] in torch; stored transposed as [2D, H].
    w1 = 0.02 * jax.random.normal(k1, (2 * latent_dim, hidden), dtype=jnp.float32)
    b1 = jnp.zeros((1, hidden), dtype=jnp.float32)
    # nn.Linear(H, 1).weight is [1, H]; kept as a [1, H] row vector.
    w2t = 0.02 * jax.random.normal(k2, (1, hidden), dtype=jnp.float32)
    b2 = jnp.zeros((1, 1), dtype=jnp.float32)
    return {"w1": w1, "b1": b1, "w2t": w2t, "b2": b2}


def _reference_forward(z1, z2, params, perm_key):
    """Pure-JAX reference (includes b2, which cancels) for correctness checks."""
    B = z1.shape[0]
    idx = jax.random.permutation(perm_key, B)
    joint = jnp.concatenate([z1, z2], axis=1)
    marginal = jnp.concatenate([z1, z2[idx]], axis=1)

    def net(x):
        h = jnp.maximum(
            jnp.dot(x, params["w1"], precision=jax.lax.Precision.HIGHEST)
            + params["b1"], 0.0)
        return jnp.dot(h, params["w2t"].T,
                       precision=jax.lax.Precision.HIGHEST) + params["b2"]

    t_j = net(joint)
    t_m = net(marginal)
    max_val = jnp.max(t_m)
    lme = jnp.log(jnp.mean(jnp.exp(t_m - max_val))) + max_val
    return jnp.mean(t_j) - lme


if __name__ == "__main__":
    latent_dim = 16
    batch = 8
    num_perms = 4

    key = jax.random.PRNGKey(0)
    k_z1, k_z2, k_params, k_perm = jax.random.split(key, 4)

    z1 = jax.random.normal(k_z1, (batch, latent_dim), dtype=jnp.float32)
    z2 = jax.random.normal(k_z2, (batch, latent_dim), dtype=jnp.float32)
    params = init_mine_params(k_params, latent_dim=latent_dim)

    # Batched: S permutations under a single pallas_call with grid=(S,).
    mi_batched = jax.block_until_ready(
        mine_strict_forward_batched(z1, z2, params, k_perm, num_perms))
    ref_batched = jax.block_until_ready(jnp.stack([
        _reference_forward(z1, z2, params, k)
        for k in jax.random.split(k_perm, num_perms)]))
    assert jnp.allclose(mi_batched, ref_batched, atol=1e-5, rtol=1e-5), (
        mi_batched, ref_batched)

    # Single-permutation forward (torch-module semantics).
    mi_single = jax.block_until_ready(mine_strict_forward(z1, z2, params, k_perm))
    ref_single = jax.block_until_ready(
        _reference_forward(z1, z2, params, jax.random.split(k_perm, 1)[0]))
    assert jnp.allclose(mi_single, ref_single, atol=1e-5, rtol=1e-5), (
        mi_single, ref_single)

    print("KERNEL_OK")
</pallas_src>

<mosaic_0001>
module attributes {stable_mosaic.version = 11 : i64} {
  func.func @_mine_kernel(%arg0: i32, %arg1: memref<1x8x1xi32, #tpu.memory_space<vmem>>, %arg2: memref<8x32xf32, #tpu.memory_space<vmem>>, %arg3: memref<32x256xf32, #tpu.memory_space<vmem>>, %arg4: memref<2x256xf32, #tpu.memory_space<vmem>>, %arg5: memref<1x1x1xf32, #tpu.memory_space<vmem>>) attributes {dimension_semantics = [#tpu.dimension_semantics<parallel>], iteration_bounds = array<i64: 4>, scalar_prefetch = 0 : i64, scratch_operands = 0 : i64, tpu.core_type = #tpu.core_type<tc>, window_params = [{transform_indices = @transform_0, window_bounds = array<i64: 1, 8, 1>}, {pipeline_mode = #tpu.pipeline_mode<synchronous>, transform_indices = @transform_1, window_bounds = array<i64: 8, 32>}, {pipeline_mode = #tpu.pipeline_mode<synchronous>, transform_indices = @transform_2, window_bounds = array<i64: 32, 256>}, {pipeline_mode = #tpu.pipeline_mode<synchronous>, transform_indices = @transform_3, window_bounds = array<i64: 2, 256>}, {transform_indices = @transform_4, window_bounds = array<i64: 1, 1, 1>}]} {
    %c0 = arith.constant 0 : index
    %c0_0 = arith.constant 0 : index
    %0 = vector.load %arg2[%c0, %c0_0] : memref<8x32xf32, #tpu.memory_space<vmem>>, vector<8x32xf32>
    %c0_1 = arith.constant 0 : index
    %c0_2 = arith.constant 0 : index
    %1 = vector.load %arg3[%c0_1, %c0_2] : memref<32x256xf32, #tpu.memory_space<vmem>>, vector<32x256xf32>
    %c0_3 = arith.constant 0 : index
    %c0_4 = arith.constant 0 : index
    %2 = vector.load %arg4[%c0_3, %c0_4] : memref<2x256xf32, #tpu.memory_space<vmem>>, vector<1x256xf32>
    %c1 = arith.constant 1 : index
    %c0_5 = arith.constant 0 : index
    %3 = vector.load %arg4[%c1, %c0_5] : memref<2x256xf32, #tpu.memory_space<vmem>>, vector<1x256xf32>
    %c0_6 = arith.constant 0 : index
    %c0_7 = arith.constant 0 : index
    %c0_8 = arith.constant 0 : index
    %4 = vector.load %arg1[%c0_6, %c0_7, %c0_8] : memref<1x8x1xi32, #tpu.memory_space<vmem>>, vector<1x8x1xi32>
    %5 = vector.shape_cast %4 : vector<1x8x1xi32> to vector<8x1xi32>
    %6 = tpu.iota {dimensions = array<i32: 1>} : vector<8x8xi32>
    %7 = vector.broadcast %5 : vector<8x1xi32> to vector<8x8xi32>
    %8 = arith.cmpi eq, %6, %7 : vector<8x8xi32>
    %9 = arith.extui %8 : vector<8x8xi1> to vector<8x8xi32>
    %10 = arith.sitofp %9 : vector<8x8xi32> to vector<8x8xf32>
    %cst = arith.constant dense<0.000000e+00> : vector<8x32xf32>
    %11 = tpu.matmul %10, %0, %cst {dimension_numbers = #tpu.dot_dimension_numbers<[1], [0], [0], [1], [0, 0, 1, 1], [], []>} : vector<8x8xf32>, vector<8x32xf32>, vector<8x32xf32> -> vector<8x32xf32>
    %12 = tpu.iota {dimensions = array<i32: 1>} : vector<8x32xi32>
    %c16_i32 = arith.constant 16 : i32
    %13 = vector.broadcast %c16_i32 : i32 to vector<8x32xi32>
    %14 = arith.cmpi slt, %12, %13 : vector<8x32xi32>
    %15 = arith.select %14, %0, %11 : vector<8x32xi1>, vector<8x32xf32>
    %16 = tpu.concatenate %0, %15 in 0 : vector<8x32xf32>, vector<8x32xf32> -> vector<16x32xf32>
    %cst_9 = arith.constant dense<0.000000e+00> : vector<16x256xf32>
    %17 = tpu.matmul %16, %1, %cst_9 {dimension_numbers = #tpu.dot_dimension_numbers<[1], [0], [0], [1], [0, 0, 1, 1], [], []>} : vector<16x32xf32>, vector<32x256xf32>, vector<16x256xf32> -> vector<16x256xf32>
    %18 = vector.broadcast %2 : vector<1x256xf32> to vector<16x256xf32>
    %19 = arith.addf %17, %18 : vector<16x256xf32>
    %cst_10 = arith.constant 0.000000e+00 : f32
    %20 = vector.broadcast %cst_10 : f32 to vector<16x256xf32>
    %21 = arith.maximumf %19, %20 : vector<16x256xf32>
    %22 = vector.extract_strided_slice %21 {offsets = [0, 0], sizes = [8, 256], strides = [1, 1]} : vector<16x256xf32> to vector<8x256xf32>
    %23 = vector.extract_strided_slice %21 {offsets = [8, 0], sizes = [8, 256], strides = [1, 1]} : vector<16x256xf32> to vector<8x256xf32>
    %cst_11 = arith.constant dense<0.000000e+00> : vector<256xf32>
    %24 = vector.multi_reduction <add>, %22, %cst_11 [0] : vector<8x256xf32> to vector<256xf32>
    %25 = vector.shape_cast %24 : vector<256xf32> to vector<1x256xf32>
    %26 = arith.mulf %25, %3 : vector<1x256xf32>
    %27 = vector.shape_cast %26 : vector<1x256xf32> to vector<1x1x256xf32>
    %cst_12 = arith.constant dense<0.000000e+00> : vector<1xf32>
    %28 = vector.multi_reduction <add>, %27, %cst_12 [1, 2] : vector<1x1x256xf32> to vector<1xf32>
    %29 = vector.shape_cast %28 : vector<1xf32> to vector<1x1x1xf32>
    %30 = vector.extract %29[0, 0, 0] : f32 from vector<1x1x1xf32>
    %cst_13 = arith.constant 1.250000e-01 : f32
    %31 = arith.mulf %30, %cst_13 : f32
    %32 = vector.broadcast %3 : vector<1x256xf32> to vector<8x256xf32>
    %33 = arith.mulf %23, %32 : vector<8x256xf32>
    %cst_14 = arith.constant dense<0.000000e+00> : vector<8xf32>
    %34 = vector.multi_reduction <add>, %33, %cst_14 [1] : vector<8x256xf32> to vector<8xf32>
    %35 = vector.shape_cast %34 : vector<8xf32> to vector<8x1xf32>
    %36 = vector.shape_cast %35 : vector<8x1xf32> to vector<1x8x1xf32>
    %cst_15 = arith.constant dense<0xFF800000> : vector<1xf32>
    %37 = vector.multi_reduction <maximumf>, %36, %cst_15 [1, 2] : vector<1x8x1xf32> to vector<1xf32>
    %38 = vector.shape_cast %37 : vector<1xf32> to vector<1x1x1xf32>
    %39 = vector.extract %38[0, 0, 0] : f32 from vector<1x1x1xf32>
    %40 = vector.broadcast %39 : f32 to vector<8x1xf32>
    %41 = arith.subf %35, %40 : vector<8x1xf32>
    %42 = math.exp %41 : vector<8x1xf32>
    %43 = vector.shape_cast %42 : vector<8x1xf32> to vector<1x8x1xf32>
    %cst_16 = arith.constant dense<0.000000e+00> : vector<1xf32>
    %44 = vector.multi_reduction <add>, %43, %cst_16 [1, 2] : vector<1x8x1xf32> to vector<1xf32>
    %45 = vector.shape_cast %44 : vector<1xf32> to vector<1x1x1xf32>
    %46 = vector.extract %45[0, 0, 0] : f32 from vector<1x1x1xf32>
    %cst_17 = arith.constant 8.000000e+00 : f32
    %47 = arith.divf %46, %cst_17 : f32
    %48 = math.log %47 : f32
    %49 = arith.addf %48, %39 : f32
    %50 = arith.subf %31, %49 : f32
    %51 = vector.broadcast %50 : f32 to vector<1x1x1xf32>
    %c0_18 = arith.constant 0 : index
    %c0_19 = arith.constant 0 : index
    %c0_20 = arith.constant 0 : index
    %52 = vector.load %arg5[%c0_18, %c0_19, %c0_20] : memref<1x1x1xf32, #tpu.memory_space<vmem>>, vector<1x1x1xf32>
    tpu.vector_store %arg5[%c0_18, %c0_19, %c0_20], %51 {strides = array<i32>} : memref<1x1x1xf32, #tpu.memory_space<vmem>>, vector<1x1x1xf32>,
    return
  }
  func.func @transform_0(%arg0: i32) -> (i32, i32, i32) {
    %c0_i32 = arith.constant 0 : i32
    %c0_i32_0 = arith.constant 0 : i32
    %c0_i32_1 = arith.constant 0 : i32
    return %arg0, %c0_i32, %c0_i32_0 : i32, i32, i32
  }
  func.func @transform_1(%arg0: i32) -> (i32, i32) {
    %c0_i32 = arith.constant 0 : i32
    %c0_i32_0 = arith.constant 0 : i32
    %c0_i32_1 = arith.constant 0 : i32
    return %c0_i32, %c0_i32_0 : i32, i32
  }
  func.func @transform_2(%arg0: i32) -> (i32, i32) {
    %c0_i32 = arith.constant 0 : i32
    %c0_i32_0 = arith.constant 0 : i32
    %c0_i32_1 = arith.constant 0 : i32
    return %c0_i32, %c0_i32_0 : i32, i32
  }
  func.func @transform_3(%arg0: i32) -> (i32, i32) {
    %c0_i32 = arith.constant 0 : i32
    %c0_i32_0 = arith.constant 0 : i32
    %c0_i32_1 = arith.constant 0 : i32
    return %c0_i32, %c0_i32_0 : i32, i32
  }
  func.func @transform_4(%arg0: i32) -> (i32, i32, i32) {
    %c0_i32 = arith.constant 0 : i32
    %c0_i32_0 = arith.constant 0 : i32
    %c0_i32_1 = arith.constant 0 : i32
    return %arg0, %c0_i32, %c0_i32_0 : i32, i32, i32
  }
}

</mosaic_0001>

<bundles_post_ra>
// kernel: tpu_custom_call.1
= control target key start
LH: loop header
LB: loop body
LE: loop exit
PB: predicated region body
PF: predicated region fallthrough
CT: control target
= control target key end

     0   :  { %9 = vsyncpa [#allocation3], 0  ;;  %s681_s15 = smov 0   ;;  %s757_s0 = inlined_call_operand.vmem [shape: s32[4,8,1], index: 0, kind: input, shape index: {}]   ;;  %s758_s1 = inlined_call_operand.vmem [shape: f32[8,32], index: 1, kind: input, shape index: {}]   ;;  %s759_s2 = inlined_call_operand.hbm [shape: f32[32,256], index: 2, kind: input, shape index: {}]   ;;  %s760_s3 = inlined_call_operand.vmem [shape: f32[2,256], index: 3, kind: input, shape index: {}]   ;;  %s761_s4 = inlined_call_operand.vmem [shape: f32[4,1,1], index: 4, kind: output, shape index: {}]  }
   0x1 LB: > { %s687_s16 = sadd.s32 4294967295, %s648_s15   ;;  %p541_p0 = scmp.ge.s32.totalorder %s648_s15, 1  ;;  %s648_s15 = sphi %s681_s15, %s15_s15  }
   0x2   : > { %p135_p1 = scmp.lt.s32.totalorder %s648_s15, 5  ;;  %s650_s17 = smov [#allocation2]  }
   0x3   : > { %s150_s18 = sshll.u32 %s650_s17, 4  ;;  %p762_p3 = scmp.eq.s32.totalorder %s687_s16, 0  ;;  %s151_s18 = int_to_ptr.vmem [resolvable:$true] %s150_s18 }
   0x4   : > { %p691_p2 = pnand %p541_p0, %p135_p1  ;;  %s610_s23 = scalar_lea.hbm %s759_s2, 1024 }
   0x5   : > { %p611_p6 = scmp.ne.s32.totalorder %s759_s2, %s610_s23  ;;  %p617_p10 = scmp.lt.u32.totalorder %s610_s23, %s759_s2 }
   0x6   : > { %s764_s19 = scalar_select %p691_p2, 1, 0 }
   0x7   : > { %p585_p4 = pneg %p691_p2 }
   0x9   : > { %p700_p5 = pnand %p762_p3, %p585_p4 }
   0xb   : > { %p612_p7 = pneg %p700_p5 }
   0xd   : > { %p613_p8 = pnand %p612_p7, %p611_p6 }
   0xf   : > { %p614_p9 = pneg %p613_p8 }
  0x11   : > { %p619_p11 = pnand %p617_p10, %p614_p9 }
  0x13   : > { %622 = shalt.err (!%p619_p11)
}
  0x14   : > { %s623_s28 = scalar_lea.vmem %s151_s18, 1024  ;;  %p631_p1 = scmp.lt.s32.totalorder %s151_s18, %s151_s18 }
  0x15   : > { %p624_p12 = scmp.ne.s32.totalorder %s151_s18, %s623_s28  ;;  %p632_p4 = scmp.lt.s32.totalorder %s623_s28, %s623_s28 }
  0x17   : > { %p626_p13 = pnand %p624_p12, %p612_p7  ;;  %p633_p3 = por %p632_p4, %p631_p1 }
  0x19   : > { %p627_p0 = pneg %p626_p13 }
  0x1b   : > { %p634_p2 = pnand %p633_p3, %p627_p0 }
  0x1d   : > { %637 = shalt.err (!%p634_p2)
}
  0x1e   : > { %s651_s29 = smov 256   ;;  %s652_s30 = smov 16  }
  0x1f   : > { %588 = dma.hbm_to_vmem [thread:$0]  (!%p700_p5), %s759_s2, 1024, %s151_s18, [#allocation3], %s651_s29, %s651_s29, %s652_s30  }
  0x20   : > { %p766_p6 = scmp.ne.s32.totalorder %s764_s19, 0 }
  0x21   : > { %p767_p8 = scmp.eq.s32.totalorder (!%p766_p6), %s687_s16, 0 }
  0x22   : > { %176 = sbr.rel (%p766_p6) target bundleno = 1109 (0x455), region = 36 }
  0x29   : > { %643 = dma.done.wait (%p767_p8), [#allocation3], 1024   ;;  %p768_p7 = pmov %p767_p8 }
  0x2a   : > { %p199_p2 = scmp.lt.s32.totalorder %s687_s16, 3  ;;  %v653_v0 = vmov 0   ;;  %v654_v1 = vmov 0.0   ;;  %v206_v3 = vld [vmem:[%s758_s1] sm:$0xff]  ;;  %vm655_vm0 = vmmov 0   ;;  %v208_v4 = vld [vmem:[#allocation2 + $0x8] sm:$0xff]  ;;  %v219_v16 = vlaneseq }
  0x2b   : > { %645 = vsyncadd (%p768_p7), [#allocation3], 4294966272  ;;  %605 = vset.pattern.permute.xlu0 %v653_v0  ;;  %556 = vmatprep.subr.mxu0 %v654_v1  ;;  %v210_v5 = vld [vmem:[#allocation2 + $0x18] sm:$0xff]  ;;  %v207_v6 = vld [vmem:[#allocation2] sm:$0xff]  ;;  %vm227_vm1 = vcmask 64512   ;;  %vm314_vm3 = vcmask 261120  }
  0x2c   : > { %s770_s16 = smov (!%p199_p2, %s687_s16), 3  ;;  %391 = vmatprep.mubr.f32.mxu1 %v654_v1  ;;  %557 = vmatpush3.msra.mxu0 %v206_v3  ;;  %v561_v7 = vpack.c.bf16 %v210_v5, %v208_v4  ;;  %v209_v8 = vld [vmem:[#allocation2 + $0x10] sm:$0xff]  ;;  %v212_v9 = vld [vmem:[#allocation2 + $0x28] sm:$0xff]  ;;  %v214_v10 = vld [vmem:[#allocation2 + $0x38] sm:$0xff]  ;;  %v220_v17 = vand.u32 127, %v219_v16  ;;  %v305_v20 = vshrl.u32 %v219_v16, 7 }
  0x2d   : > { %s546_s7 = sshll.u32 %s770_s16, 3  ;;  %558 = vmatprep.mubr.msk.f32.mxu0 %vm655_vm0, %v654_v1  ;;  %v563_v11 = vpack.c.bf16 %v209_v8, %v207_v6  ;;  %v565_v12 = vpack.c.bf16 %v214_v10, %v212_v9  ;;  %v211_v13 = vld [vmem:[#allocation2 + $0x20] sm:$0xff]  ;;  %v213_v14 = vld [vmem:[#allocation2 + $0x30] sm:$0xff]  ;;  %vm427_vm5 = vcmask 1040384   ;;  %vm457_vm6 = vcmask 7168   ;;  %s205_s28 = scalar_lea.vmem %s761_s4, %s770_s16 }
  0x2e   : > { %s202_s10 = scalar_lea.vmem %s757_s0, %s546_s7  ;;  %562 = vmatprep.subr.bf16.mxu0 %v561_v7  ;;  %569 = vmatprep.subr.bf16.mxu1 %v561_v7  ;;  %v567_v15 = vpack.c.bf16 %v213_v14, %v211_v13  ;;  %vm301_vm4 = vcmp.lt.s32.totalorder %v220_v17, 16  ;;  %v306_v24 = vsub.s32 0, %v305_v20  ;;  %v215_v25 = vld [vmem:[%s760_s3] ss:$2 sm:$0x3]  ;;  %v310_v26 = vsub.s32 1, %v305_v20 }
  0x2f   : > { %v218_v2 = vld [vmem:[%s202_s10] sm:$0xff]  ;;  %571 = vmatpush1.bf16.msra.mxu1 %v563_v11  ;;  %vm478_vm7 = vcmask 0  }
  0x30   : > { %222 = vperm.xlu0 %605, %v218_v2   ;;  %570 = vmatprep.subr.bf16.mxu1 %v565_v12  ;;  %v307_v27 = vrot.slane %v215_v25, %v306_v24  ;;  %v311_v28 = vrot.slane %v215_v25, %v310_v26  ;;  %v547_v41 = vld [vmem:[%s760_s3 + $0x1] ss:$2 sm:$0x3] }
  0x31   : > { %v418_v45 = vrot.slane %v547_v41, %v306_v24  ;;  %v422_v47 = vrot.slane %v547_v41, %v310_v26 }
  0x33   : > { %572 = vmatpush1.bf16.msra.mxu1 %v567_v15 }
  0xaf   : > { %v223_v18 = vpop.permute.xlu0 %222 }
  0xb0   : > { %vm224_vm2 = vcmp.eq.s32.totalorder %v220_v17, %v223_v18 }
  0xb1   : > { %v548_v19 = vsel %vm224_vm2, 1.0, %v654_v1 }
  0xb2   : > { %559 = vmatmul.mubr.msk.f32.vlgmr.msra.gmra.mrb[0].mxu0 %vm227_vm1, %v548_v19 }
  0xb3   : > { %564 = vmatpush1.bf16.msra.mxu0 %v563_v11  ;;  %385 = vmatprep.mubr.f32.mxu0 %v654_v1 }
  0xb4   : > { %566 = vmatprep.subr.bf16.mxu0 %v565_v12 }
  0xb7   : > { %568 = vmatpush1.bf16.msra.mxu0 %v567_v15 }
  0xba   : > { %550 = vmatmul.mubr.msk.f32.vlgmr.msra.gmra.mrb[2].mxu0 %vm314_vm3, %v206_v3 }
 0x185   : > { %v297_v21 = vpop.f32.mrb[0].mxu0 }
 0x186   : > { %v302_v22 = vsel %vm301_vm4, %v206_v3, %v297_v21  ;;  %v560_v23 = vpop.f32.mrb[1].mxu0 }
 0x187   : > { %551 = vmatmul.mubr.msk.f32.vlgmr.msra.gmra.mrb[0].mxu1 %vm314_vm3, %v302_v22 }
 0x18d   : > { %v387_v29 = vpop.f32.mrb[2].mxu0 }
 0x18e   : > { %v388_v30 = vadd.f32 %v387_v29, %v307_v27  ;;  %v389_v31 = vpop.f32.mrb[3].mxu0 }
 0x18f   : > { %v390_v32 = vadd.f32 %v389_v31, %v311_v28 }
 0x190   : > { %v398_v33 = vmax.f32 %v388_v30, 0.0 }
 0x191   : > { %v399_v34 = vmax.f32 %v390_v32, 0.0 }
 0x192   : > { %v402_v35 = vrot.slane %v398_v33, 4 }
 0x193   : > { %v408_v36 = vrot.slane %v399_v34, 4 }
 0x194   : > { %v403_v37 = vadd.f32 %v402_v35, %v398_v33 }
 0x195   : > { %v409_v38 = vadd.f32 %v408_v36, %v399_v34 }
 0x196   : > { %v404_v39 = vrot.slane %v403_v37, 2 }
 0x197   : > { %v410_v40 = vrot.slane %v409_v38, 2 }
 0x198   : > { %v405_v42 = vadd.f32 %v404_v39, %v403_v37 }
 0x199   : > { %v411_v43 = vadd.f32 %v410_v40, %v409_v38 }
 0x19a   : > { %v406_v44 = vrot.slane %v405_v42, 1 }
 0x19b   : > { %v412_v46 = vrot.slane %v411_v43, 1 }
 0x19c   : > { %v407_v48 = vadd.f32 %v406_v44, %v405_v42 }
 0x19d   : > { %v413_v49 = vadd.f32 %v412_v46, %v411_v43 }
 0x19e   : > { %v425_v50 = vmul.f32 %v418_v45, %v407_v48 }
 0x19f   : > { %v426_v51 = vmul.f32 %v422_v47, %v413_v49 }
 0x1a0   : > { %v428_v52 = vsel %vm427_vm5, %v425_v50, 0.0 }
 0x1a1   : > { %v429_v53 = vsel %vm427_vm5, %v426_v51, 0.0 }
 0x1a2   : > { %v430_v54 = vadd.f32 %v429_v53, %v428_v52 }
 0x1a4   : > { %431 = vadd.xlane.f32.xlu0 %v430_v54 }
 0x231   : > { %v432_v59 = vpop.xlane.xlu0 %431 }
 0x232   : > { %v433_v63 = vrot.slane %v432_v59, 4 }
 0x234   : > { %v434_v2 = vadd.f32 %v433_v63, %v432_v59 }
 0x236   : > { %v435_v3 = vrot.slane %v434_v2, 2 }
 0x238   : > { %v436_v4 = vadd.f32 %v435_v3, %v434_v2 }
 0x23a   : > { %v437_v5 = vrot.slane %v436_v4, 1 }
 0x23c   : > { %v438_v6 = vadd.f32 %v437_v5, %v436_v4 }
 0x23e   : > { %573 = vpush %v438_v6 }
 0x25a   : > { %v393_v55 = vpop.f32.mrb[0].mxu1 }
 0x25b   : > { %v394_v56 = vadd.f32 %v393_v55, %v307_v27  ;;  %v395_v57 = vpop.f32.mrb[1].mxu1 }
 0x25c   : > { %v396_v58 = vadd.f32 %v395_v57, %v311_v28 }
 0x25d   : > { %v400_v60 = vmax.f32 %v394_v56, 0.0 }
 0x25e   : > { %v401_v61 = vmax.f32 %v396_v58, 0.0 }
 0x25f   : > { %v441_v62 = vmul.f32 %v418_v45, %v400_v60 }
 0x260   : > { %v442_v0 = vmul.f32 %v422_v47, %v401_v61 }
 0x262   : > { %v443_v1 = vadd.f32 %v442_v0, %v441_v62 }
 0x264   : > { %444 = vadd.xlane.f32.xlu1 %v443_v1 }
 0x26f   : > { %s743_s19 = spop %573 }
 0x270   : > { %s440_s24 = smul.f32 0.125, %s743_s19 }
 0x2f1   : > { %v445_v7 = vpop.xlane.xlu1 %444 }
 0x2f2   : > { %v446_v8 = vrot.slane %v445_v7, 4 }
 0x2f4   : > { %v447_v9 = vmax.f32 %v445_v7, %v446_v8 }
 0x2f6   : > { %v448_v10 = vrot.slane %v447_v9, 2 }
 0x2f8   : > { %v449_v11 = vmax.f32 %v447_v9, %v448_v10 }
 0x2fa   : > { %v450_v12 = vrot.slane %v449_v11, 1 }
 0x2fc   : > { %v451_v13 = vmax.f32 %v449_v11, %v450_v12 }
 0x2fe   : > { %575 = vpush %v451_v13 }
 0x32f   : > { %s745_s20 = spop %575 }
 0x330   : > { %v453_v14 = vstv %s745_s20 }
 0x331   : > { %v454_v15 = vsub.f32 %v445_v7, %v453_v14 }
 0x333   : > { %v455_v16 = vmul.f32 1.442695, %v454_v15 }
 0x335   : > { %606 = vpow2.f32 %v455_v16 }
 0x33f   : > { %v607_v17 = vpop.eup %606 }
 0x340   : > { %v458_v18 = vsel %vm457_vm6, %v607_v17, 0.0 }
 0x341   : > { %459 = vadd.xlane.f32.xlu1 %v458_v18 }
 0x3ce   : > { %v460_v19 = vpop.xlane.xlu1 %459 }
 0x3cf   : > { %v461_v20 = vrot.slane %v460_v19, 4 }
 0x3d1   : > { %v462_v21 = vadd.f32 %v461_v20, %v460_v19 }
 0x3d3   : > { %v463_v22 = vrot.slane %v462_v21, 2 }
 0x3d5   : > { %v464_v23 = vadd.f32 %v463_v22, %v462_v21 }
 0x3d7   : > { %v465_v24 = vrot.slane %v464_v23, 1 }
 0x3d9   : > { %v466_v25 = vadd.f32 %v465_v24, %v464_v23 }
 0x3db   : > { %577 = vpush %v466_v25 }
 0x40c   : > { %s578_s21 = spop %577 }
 0x40d   : > { %s470_s22 = smul.f32 0.125, %s578_s21 }
 0x40f   : > { %v471_v26 = vstv %s470_s22 }
 0x410   : > { %608 = vlog2.f32 %v471_v26 }
 0x41a   : > { %v609_v27 = vpop.eup %608 }
 0x41b   : > { %v473_v28 = vmul.f32 0.6931472, %v609_v27 }
 0x41d   : > { %579 = vpush %v473_v28 }
 0x44e   : > { %s580_s23 = spop %579 }
 0x44f   : > { %s475_s25 = sadd.f32 %s580_s23, %s745_s20 }
 0x451   : > { %s476_s29 = ssub.f32 %s440_s24, %s475_s25 }
 0x453   : > { %v477_v29 = vstv %s476_s29 }
 0x454   : > { %479 = vst.msk [vmem:[%s205_s28] sm:$0x1] %vm478_vm7, %v477_v29 }
 0x455 PF: > { %s15_s15 = sadd.s32 1, %s648_s15  }
 0x456   : > { %p12_p3 = scmp.ge.s32.totalorder %s15_s15, 6  }
 0x458   :  { %14 = sbr.rel (!%p12_p3) target bundleno = 1 (0x1), region = 72 }
 0x45f   :  { %497 = vsyncpa [#allocation3], 1 }
 0x460   :  { %499 = vsyncpa [#allocation3 + $0x1], 1 }

</bundles_post_ra>
